<compile_context>
chip_gen: v6e
topology: v6e:2x2x1
jax: 0.10.0
libtpu: 0.0.40
codegen_flags: <defaults>
</compile_context>

<pallas_src>
import jax
import jax.numpy as jnp
from jax import lax
from jax.experimental import pallas as pl
from jax.experimental.pallas import tpu as pltpu

# ---------------------------------------------------------------------------
# Problem configuration (small shapes consistent with the module).
# ---------------------------------------------------------------------------
BATCH = 2
C_IN = 4
C_OUT = 12                      # output_channels
KERNEL_SIZES = (3, 5, 7)
N_BRANCH = len(KERNEL_SIZES)
C_MID = C_OUT // N_BRANCH       # per-branch channels = 4
N_HALF = N_BRANCH * C_MID       # stacked branch channels = 12
TOTAL = C_MID * (N_BRANCH + 1)  # concat channels = 16
SEQ = 16                        # seq_len
K_MAX = max(KERNEL_SIZES)       # 7
PAD = K_MAX // 2                # 3
ROWS = K_MAX * C_IN + 1         # im2col width + ones column = 29
BN_EPS = 1e-5


# ---------------------------------------------------------------------------
# Pallas kernel: single invocation, whole (batch-folded) problem at once.
#   x_ref : (M, ROWS)            im2col'd input with trailing ones column
#   w_ref : (ROWS, 2*C_OUT)      [branch conv | pointwise∘proj], biases in last row
#   wp_ref: (N_HALF, C_OUT)      branch half of the 1x1 output projection
# ---------------------------------------------------------------------------
def _msconv_kernel(x_ref, w_ref, wp_ref, o_ref):
    x = x_ref[...]
    y = jnp.dot(x, w_ref[...], preferred_element_type=jnp.float32)  # (M, 24)
    h = jnp.maximum(y[:, :N_HALF], 0.0)          # branch convs + BN + bias, ReLU
    pw = y[:, N_HALF:]                           # pointwise path (bias folded)
    out = jnp.dot(h, wp_ref[...], preferred_element_type=jnp.float32) + pw
    o_ref[...] = out.astype(o_ref.dtype)


# ---------------------------------------------------------------------------
# One-time parameter folding (call once per parameter update, NOT per forward).
# ---------------------------------------------------------------------------
def fold_params(params):
    # Fold BN (eval mode) into each branch's conv weight/bias; stack branches
    # along the output axis at their centre-aligned tap offsets.
    w_all = jnp.zeros((N_BRANCH, K_MAX, C_IN, C_MID), jnp.float32)
    b_all = jnp.zeros((N_BRANCH, C_MID), jnp.float32)
    for br, k in enumerate(KERNEL_SIZES):
        w = params[f"conv{k}_w"]            # [C_mid, C_in, k] (PyTorch OIK)
        b = params[f"conv{k}_b"]            # [C_mid]
        scale = params[f"bn{k}_gamma"] / jnp.sqrt(params[f"bn{k}_var"] + BN_EPS)
        w_kio = jnp.transpose(w, (2, 1, 0)) * scale[None, None, :]  # [k,Cin,Cmid]
        b_eff = (b - params[f"bn{k}_mean"]) * scale + params[f"bn{k}_beta"]
        off = PAD - k // 2
        w_all = w_all.at[br, off:off + k].set(w_kio)
        b_all = b_all.at[br].set(b_eff)

    # (K_MAX*C_IN, N_HALF): row index = t*C_IN + c, col = br*C_MID + m
    w_branch = jnp.transpose(w_all, (1, 2, 0, 3)).reshape(K_MAX * C_IN, N_HALF)
    b_branch = b_all.reshape(N_HALF)

    # 1x1 output projection split into branch rows / pointwise rows.
    w_proj = jnp.transpose(params["proj_w"][:, :, 0])        # (TOTAL, C_OUT)
    w_proj_branch = w_proj[:N_HALF, :]                       # (12, C_OUT)
    w_proj_pw = w_proj[N_HALF:, :]                           # (C_MID, C_OUT)

    # Pointwise conv folded through the projection -> (C_IN, C_OUT), embedded
    # at the centre-tap rows of a zero (K_MAX*C_IN, C_OUT) matrix so the kernel
    # reuses the im2col input directly (zero rows contribute exactly 0).
    w_pw = jnp.transpose(params["pw_w"][:, :, 0])             # (C_IN, C_MID)
    w_pw_out = jnp.dot(w_pw, w_proj_pw)                       # (C_IN, C_OUT)
    w_lin = jnp.zeros((K_MAX * C_IN, C_OUT), jnp.float32)
    w_lin = w_lin.at[PAD * C_IN:(PAD + 1) * C_IN, :].set(w_pw_out)

    # Combined output-path bias: pw bias pushed through projection + proj bias.
    b_out = jnp.dot(params["pw_b"], w_proj_pw) + params["proj_b"]   # (C_OUT,)

    # hstack the two linear maps and fold both biases in as a trailing row
    # (matched by the ones column appended to the im2col input).
    left = jnp.concatenate([w_branch, b_branch[None, :]], axis=0)   # (ROWS, 12)
    right = jnp.concatenate([w_lin, b_out[None, :]], axis=0)        # (ROWS, 12)
    w_big = jnp.concatenate([left, right], axis=1)                  # (ROWS, 24)

    return {"w_big": w_big, "w_proj_branch": w_proj_branch}


# ---------------------------------------------------------------------------
# Jitted forward: im2col prep + single pallas_call (2 matmuls, 3 operands).
# ---------------------------------------------------------------------------
@jax.jit
def multi_scale_conv1d(x_ncl, folded):
    """x_ncl: [B, C_in, L] float32 -> [B, C_out, L] float32 (eval mode)."""
    B, C, L = x_ncl.shape
    M = B * L

    # im2col (cheap at this size): [B,C,L] -> (B*L, K_MAX*C_IN) + ones column.
    x_blc = jnp.transpose(x_ncl, (0, 2, 1))                  # [B, L, C_in]
    x_pad = jnp.pad(x_blc, ((0, 0), (PAD, PAD), (0, 0)))     # [B, L+2P, C_in]
    x_unf = jnp.stack([x_pad[:, t:t + L, :] for t in range(K_MAX)], axis=2)
    x_unf = x_unf.reshape(M, K_MAX * C_IN)
    x_aug = jnp.concatenate(
        [x_unf, jnp.ones((M, 1), x_unf.dtype)], axis=-1)     # (M, ROWS)

    cost = pl.CostEstimate(
        flops=2 * M * ROWS * 2 * C_OUT + 2 * M * N_HALF * C_OUT,
        transcendentals=0,
        bytes_accessed=4 * (M * ROWS + ROWS * 2 * C_OUT
                            + N_HALF * C_OUT + M * C_OUT))

    out_flat = pl.pallas_call(
        _msconv_kernel,
        out_shape=jax.ShapeDtypeStruct((M, C_OUT), jnp.float32),
        in_specs=[pl.BlockSpec(memory_space=pltpu.MemorySpace.VMEM)] * 3,
        out_specs=pl.BlockSpec(memory_space=pltpu.MemorySpace.VMEM),
        cost_estimate=cost,
    )(x_aug, folded["w_big"], folded["w_proj_branch"])

    # Back to PyTorch NCL layout.
    return jnp.transpose(out_flat.reshape(B, L, C_OUT), (0, 2, 1))


# ---------------------------------------------------------------------------
# Pure-JAX reference (same math, via lax.conv) for a correctness check.
# ---------------------------------------------------------------------------
def reference_forward(x_ncl, params):
    outs = []
    for k in KERNEL_SIZES:
        y = lax.conv_general_dilated(
            x_ncl, params[f"conv{k}_w"], window_strides=(1,),
            padding=[(k // 2, k // 2)],
            dimension_numbers=("NCH", "OIH", "NCH"))
        y = y + params[f"conv{k}_b"][None, :, None]
        scale = params[f"bn{k}_gamma"] / jnp.sqrt(params[f"bn{k}_var"] + BN_EPS)
        y = (y - params[f"bn{k}_mean"][None, :, None]) * scale[None, :, None] \
            + params[f"bn{k}_beta"][None, :, None]
        outs.append(jnp.maximum(y, 0.0))
    pw = lax.conv_general_dilated(
        x_ncl, params["pw_w"], window_strides=(1,), padding=[(0, 0)],
        dimension_numbers=("NCH", "OIH", "NCH")) + params["pw_b"][None, :, None]
    outs.append(pw)
    concat = jnp.concatenate(outs, axis=1)
    out = lax.conv_general_dilated(
        concat, params["proj_w"], window_strides=(1,), padding=[(0, 0)],
        dimension_numbers=("NCH", "OIH", "NCH")) + params["proj_b"][None, :, None]
    return out


# ---------------------------------------------------------------------------
# Deterministic parameter init (matches PyTorch module's parameter shapes).
# ---------------------------------------------------------------------------
def init_params(key):
    params = {}
    for k in KERNEL_SIZES:
        key, k1, k2, k3, k4, k5, k6 = jax.random.split(key, 7)
        params[f"conv{k}_w"] = 0.1 * jax.random.normal(k1, (C_MID, C_IN, k), jnp.float32)
        params[f"conv{k}_b"] = 0.1 * jax.random.normal(k2, (C_MID,), jnp.float32)
        params[f"bn{k}_gamma"] = 1.0 + 0.1 * jax.random.normal(k3, (C_MID,), jnp.float32)
        params[f"bn{k}_beta"] = 0.1 * jax.random.normal(k4, (C_MID,), jnp.float32)
        params[f"bn{k}_mean"] = 0.1 * jax.random.normal(k5, (C_MID,), jnp.float32)
        params[f"bn{k}_var"] = 1.0 + 0.1 * jnp.abs(jax.random.normal(k6, (C_MID,), jnp.float32))
    key, k1, k2, k3, k4 = jax.random.split(key, 5)
    params["pw_w"] = 0.1 * jax.random.normal(k1, (C_MID, C_IN, 1), jnp.float32)
    params["pw_b"] = 0.1 * jax.random.normal(k2, (C_MID,), jnp.float32)
    params["proj_w"] = 0.1 * jax.random.normal(k3, (C_OUT, TOTAL, 1), jnp.float32)
    params["proj_b"] = 0.1 * jax.random.normal(k4, (C_OUT,), jnp.float32)
    return params


if __name__ == "__main__":
    root = jax.random.PRNGKey(0)
    kx, kp = jax.random.split(root)
    x = jax.random.normal(kx, (BATCH, C_IN, SEQ), jnp.float32)  # [B, C_in, L]
    params = init_params(kp)

    # Fold parameters ONCE (outside the per-call / jitted path).
    folded = jax.tree.map(jax.block_until_ready, fold_params(params))

    out = multi_scale_conv1d(x, folded)
    out = jax.block_until_ready(out)

    ref = jax.block_until_ready(reference_forward(x, params))
    assert out.shape == (BATCH, C_OUT, SEQ), out.shape
    assert jnp.allclose(out, ref, atol=1e-4, rtol=1e-4), \
        float(jnp.max(jnp.abs(out - ref)))

    print("KERNEL_OK")
</pallas_src>

<mosaic_0001>
module attributes {stable_mosaic.version = 11 : i64} {
  func.func @_msconv_kernel(%arg0: memref<32x29xf32, #tpu.memory_space<vmem>>, %arg1: memref<29x24xf32, #tpu.memory_space<vmem>>, %arg2: memref<12x12xf32, #tpu.memory_space<vmem>>, %arg3: memref<32x12xf32, #tpu.memory_space<vmem>>) attributes {dimension_semantics = [], scalar_prefetch = 0 : i64, scratch_operands = 0 : i64, tpu.core_type = #tpu.core_type<tc>} {
    %c0 = arith.constant 0 : index
    %c0_0 = arith.constant 0 : index
    %0 = vector.load %arg0[%c0, %c0_0] : memref<32x29xf32, #tpu.memory_space<vmem>>, vector<32x29xf32>
    %c0_1 = arith.constant 0 : index
    %c0_2 = arith.constant 0 : index
    %1 = vector.load %arg1[%c0_1, %c0_2] : memref<29x24xf32, #tpu.memory_space<vmem>>, vector<29x24xf32>
    %cst = arith.constant dense<0.000000e+00> : vector<32x24xf32>
    %2 = tpu.matmul %0, %1, %cst {dimension_numbers = #tpu.dot_dimension_numbers<[1], [0], [0], [1], [0, 0, 1, 1], [], []>} : vector<32x29xf32>, vector<29x24xf32>, vector<32x24xf32> -> vector<32x24xf32>
    %3 = vector.extract_strided_slice %2 {offsets = [0, 0], sizes = [32, 12], strides = [1, 1]} : vector<32x24xf32> to vector<32x12xf32>
    %cst_3 = arith.constant 0.000000e+00 : f32
    %4 = vector.broadcast %cst_3 : f32 to vector<32x12xf32>
    %5 = arith.maximumf %3, %4 : vector<32x12xf32>
    %6 = vector.extract_strided_slice %2 {offsets = [0, 12], sizes = [32, 12], strides = [1, 1]} : vector<32x24xf32> to vector<32x12xf32>
    %c0_4 = arith.constant 0 : index
    %c0_5 = arith.constant 0 : index
    %7 = vector.load %arg2[%c0_4, %c0_5] : memref<12x12xf32, #tpu.memory_space<vmem>>, vector<12x12xf32>
    %cst_6 = arith.constant dense<0.000000e+00> : vector<32x12xf32>
    %8 = tpu.matmul %5, %7, %cst_6 {dimension_numbers = #tpu.dot_dimension_numbers<[1], [0], [0], [1], [0, 0, 1, 1], [], []>} : vector<32x12xf32>, vector<12x12xf32>, vector<32x12xf32> -> vector<32x12xf32>
    %9 = arith.addf %8, %6 : vector<32x12xf32>
    %c0_7 = arith.constant 0 : index
    %c0_8 = arith.constant 0 : index
    %10 = vector.load %arg3[%c0_7, %c0_8] : memref<32x12xf32, #tpu.memory_space<vmem>>, vector<32x12xf32>
    tpu.vector_store %arg3[%c0_7, %c0_8], %9 {strides = array<i32>} : memref<32x12xf32, #tpu.memory_space<vmem>>, vector<32x12xf32>,
    return
  }
}

</mosaic_0001>

<bundles_post_ra>
// kernel: multi_scale_conv1d.1
= control target key start
LH: loop header
LB: loop body
LE: loop exit
PB: predicated region body
PF: predicated region fallthrough
CT: control target
= control target key end

     0   :  { %vm35_vm0 = vcmask 1044480   ;;  %vm22_vm1 = vcmask 236544   ;;  %vm159_vm2 = vcmask 1043456   ;;  %vm146_vm3 = vcmask 97280   ;;  %s305_s4 = smov 116   ;;  %s380_s1 = inlined_call_operand.vmem [shape: f32[29,24], index: 1, kind: input, shape index: {}]   ;;  %s381_s0 = inlined_call_operand.vmem [shape: f32[32,29], index: 0, kind: input, shape index: {}]   ;;  %s382_s2 = inlined_call_operand.vmem [shape: f32[12,12], index: 2, kind: input, shape index: {}]   ;;  %s383_s3 = inlined_call_operand.vmem [shape: f32[32,12], index: 3, kind: output, shape index: {}]  }
   0x1   :  { %v21_v0 = vld [vmem:[%s380_s1 + $0x18] sm:$0x1f]  ;;  %v20_v1 = vld [vmem:[%s380_s1 + $0x10] sm:$0xff]  ;;  %v14_v2 = vld [vmem:[%s381_s0] sm:$0xff] }
   0x2   :  { %280 = vmatprep.subr.msk.mxu0 %vm35_vm0, %v21_v0  ;;  %v19_v3 = vld [vmem:[%s380_s1 + $0x8] sm:$0xff]  ;;  %288 = vmatprep.mubr.msk.f32.mxu0 %vm22_vm1, %v14_v2  ;;  %v18_v4 = vld [vmem:[%s380_s1] sm:$0xff]  ;;  %v16_v6 = vld [vmem:[%s381_s0 + $0x10] sm:$0xff] }
   0x3   :  { %281 = vmatpush3.msk.msra.mxu0 %vm35_vm0, %v21_v0  ;;  %v15_v5 = vld [vmem:[%s381_s0 + $0x8] sm:$0xff]  ;;  %v17_v7 = vld [vmem:[%s381_s0 + $0x18] sm:$0xff]  ;;  %v128_v9 = vld [vmem:[%s382_s2] sm:$0xff] }
   0x4   :  { %282 = vmatprep.subr.mxu0 %v20_v1  ;;  %v129_v8 = vld [vmem:[%s382_s2 + $0x8] sm:$0xf] }
   0x5   :  { %283 = vmatpush3.msra.mxu0 %v20_v1  ;;  %294 = vmatprep.subr.msk.mxu1 %vm159_vm2, %v129_v8 }
   0x6   :  { %284 = vmatprep.subr.mxu0 %v19_v3  ;;  %295 = vmatpush3.msk.msra.mxu1 %vm159_vm2, %v129_v8 }
   0x7   :  { %285 = vmatpush3.msra.mxu0 %v19_v3  ;;  %296 = vmatprep.subr.mxu1 %v128_v9 }
   0x8   :  { %286 = vmatprep.subr.mxu0 %v18_v4  ;;  %297 = vmatpush3.msra.mxu1 %v128_v9 }
   0x9   :  { %287 = vmatpush3.msra.mxu0 %v18_v4 }
   0xa   :  { %289 = vmatmul.mubr.msk.f32.vlgmr.msra.gmra.mxu0 %vm22_vm1, %v15_v5 }
   0xb   :  { %291 = vmatprep.mubr.msk.f32.mxu0 %vm22_vm1, %v16_v6 }
   0xe   :  { %292 = vmatmul.mubr.msk.f32.gmra.mxu0 %vm22_vm1, %v17_v7 }
  0xca   :  { %v290_v10 = vpop.f32.mrf.mxu0 }
  0xcb   :  { %v125_v13 = vmax.f32 %v290_v10, 0.0 }
  0xcc   :  { %v105_v11 = vpop.f32.mrf.mxu0 }
  0xcd   :  { %134 = vrot.lane.b32.xlu0 %v105_v11, %s305_s4  ;;  %v124_v12 = vmax.f32 %v105_v11, 0.0 }
  0xce   :  { %v293_v14 = vpop.f32.mrf.mxu0 }
  0xcf   :  { %298 = vmatprep.mubr.msk.f32.mxu1 %vm146_vm3, %v124_v12  ;;  %v127_v17 = vmax.f32 %v293_v14, 0.0 }
  0xd0   :  { %v115_v15 = vpop.f32.mrf.mxu0  ;;  %299 = vmatmul.mubr.msk.f32.vlgmr.msra.gmra.mxu1 %vm146_vm3, %v125_v13 }
  0xd1   :  { %v126_v16 = vmax.f32 %v115_v15, 0.0  ;;  %136 = vrot.lane.b32.xlu0 %v290_v10, %s305_s4  ;;  %138 = vrot.lane.b32.xlu1 %v115_v15, %s305_s4 }
  0xd3   :  { %301 = vmatprep.mubr.msk.f32.mxu1 %vm146_vm3, %v126_v16 }
  0xd4   :  { %302 = vmatmul.mubr.msk.f32.gmra.mxu1 %vm146_vm3, %v127_v17 }
  0xd5   :  { %140 = vrot.lane.b32.xlu1 %v293_v14, %s305_s4 }
 0x13f   :  { %v135_v18 = vpop.permute.xlu0 %134 }
 0x143   :  { %v139_v19 = vpop.permute.xlu1 %138  ;;  %v137_v20 = vpop.permute.xlu0 %136 }
 0x147   :  { %v141_v25 = vpop.permute.xlu1 %140 }
 0x190   :  { %v300_v21 = vpop.f32.mrf.mxu1 }
 0x191   :  { %v235_v22 = vadd.f32 %v300_v21, %v137_v20 }
 0x192   :  { %v229_v23 = vpop.f32.mrf.mxu1 }
 0x193   :  { %249 = vst.msk [vmem:[%s383_s3 + $0x8] sm:$0xff] %vm146_vm3, %v235_v22  ;;  %v230_v24 = vadd.f32 %v229_v23, %v135_v18 }
 0x194   :  { %v303_v26 = vpop.f32.mrf.mxu1 }
 0x195   :  { %248 = vst.msk [vmem:[%s383_s3] sm:$0xff] %vm146_vm3, %v230_v24  ;;  %v245_v27 = vadd.f32 %v303_v26, %v141_v25 }
 0x196   :  { %v239_v28 = vpop.f32.mrf.mxu1 }
 0x197   :  { %251 = vst.msk [vmem:[%s383_s3 + $0x18] sm:$0xff] %vm146_vm3, %v245_v27  ;;  %v240_v29 = vadd.f32 %v239_v28, %v139_v19 }
 0x199   :  { %250 = vst.msk [vmem:[%s383_s3 + $0x10] sm:$0xff] %vm146_vm3, %v240_v29 }

</bundles_post_ra>
